<compile_context>
chip_gen: v7x
topology: tpu7x:2x2x1
jax: 0.10.0
libtpu: 0.0.40
codegen_flags: <defaults>
</compile_context>

<pallas_src>
import functools

import jax
import jax.numpy as jnp
from jax.experimental import pallas as pl
from jax.experimental.pallas import tpu as pltpu

_MiB = 1024 * 1024


def _round_up(x, m):
    return ((x + m - 1) // m) * m


def _lora_kernel(x_ref, a_ref, b_ref, o_ref, xa_ref, *, alpha):
    # x_ref: (TM, in_dim), a_ref: (in_dim, rank), b_ref: (rank, TN),
    # o_ref: (TM, TN), xa_ref: (TM, rank) f32 scratch (persists across j).
    @pl.when(pl.program_id(1) == 0)
    def _():
        xa = jnp.dot(x_ref[...], a_ref[...], preferred_element_type=jnp.float32)
        # Scale the tiny (TM, rank) intermediate once per M tile.
        xa_ref[...] = alpha * xa

    o_ref[...] = jnp.dot(
        xa_ref[...].astype(b_ref.dtype),
        b_ref[...],
        preferred_element_type=jnp.float32,
    ).astype(o_ref.dtype)


def lora_forward(x, A, B, alpha):
    """alpha * (x @ A @ B), x: [..., in_dim]."""
    in_dim, rank = A.shape
    rank_b, out_dim = B.shape
    assert rank == rank_b and x.shape[-1] == in_dim

    lead = x.shape[:-1]
    x2d = x.reshape(-1, in_dim)
    M = x2d.shape[0]
    itemsize = jnp.dtype(x.dtype).itemsize

    # ---- generation-aware VMEM budget -----------------------------------
    try:
        vmem_cap = int(getattr(pltpu.get_tpu_info(), "vmem_capacity_bytes",
                               64 * _MiB))
    except Exception:  # pragma: no cover - defensive fallback
        vmem_cap = 64 * _MiB
    if vmem_cap >= 100 * _MiB:      # v5e / v6e: 128 MiB VMEM
        tile_budget = 56 * _MiB
        vmem_cap_limit = 100 * _MiB
    else:                           # v7x: 64 MiB VMEM -> leave headroom
        tile_budget = 36 * _MiB
        vmem_cap_limit = 52 * _MiB

    # ---- N tile: keep B / out tile fully resident when out_dim is modest ----
    if out_dim <= 2048:
        TN = out_dim                         # full dim -> always a legal block
        grid_n = 1
    else:
        TN = 1024                            # lane-dense multiple of 128
        grid_n = pl.cdiv(out_dim, TN)        # boundary tile handled by Pallas

    # ---- M tile: sized against the generation-aware budget ------------------
    # Double-buffered x (TM, in_dim) and out (TM, TN) tiles dominate VMEM use.
    bytes_per_row = 2 * (in_dim + TN) * itemsize
    TM = max(8, min(1024, (tile_budget // bytes_per_row) // 8 * 8))
    TM = min(TM, _round_up(M, 8))            # don't exceed the problem size
    if M > 8:
        # Give the v7x megacore >= 2 blocks along the "parallel" i axis.
        TM = max(8, min(TM, _round_up(-(-M // 2), 8)))
    grid_m = pl.cdiv(M, TM)

    vmem_est = itemsize * (
        2 * TM * in_dim + 2 * TM * TN + 2 * in_dim * rank + 2 * rank * TN
    ) + 4 * TM * rank
    vmem_limit = int(min(vmem_cap_limit, max(32 * _MiB, 2 * vmem_est)))

    cost = pl.CostEstimate(
        flops=2 * M * rank * (in_dim + out_dim),
        transcendentals=0,
        bytes_accessed=itemsize
        * (M * in_dim + M * out_dim + in_dim * rank + rank * out_dim),
    )

    kernel = functools.partial(_lora_kernel, alpha=float(alpha))

    out2d = pl.pallas_call(
        kernel,
        out_shape=jax.ShapeDtypeStruct((M, out_dim), x.dtype),
        grid_spec=pltpu.PrefetchScalarGridSpec(
            num_scalar_prefetch=0,
            grid=(grid_m, grid_n),
            in_specs=[
                # x tile: constant block index across j -> resident over N loop.
                pl.BlockSpec((TM, in_dim), lambda i, j: (i, 0)),
                # A: full array, VMEM-resident across the whole grid.
                pl.BlockSpec((in_dim, rank), lambda i, j: (0, 0)),
                # B: N-tiled (tiny).
                pl.BlockSpec((rank, TN), lambda i, j: (0, j)),
            ],
            out_specs=pl.BlockSpec((TM, TN), lambda i, j: (i, j)),
            scratch_shapes=[pltpu.VMEM((TM, rank), jnp.float32)],
        ),
        compiler_params=pltpu.CompilerParams(
            # j must be "arbitrary": the xa scratch is filled at j == 0 and
            # reused for j > 0 on the same core.
            dimension_semantics=("parallel", "arbitrary"),
            vmem_limit_bytes=vmem_limit,
        ),
        cost_estimate=cost,
    )(x2d, A, B)

    return out2d.reshape(*lead, out_dim)


if __name__ == "__main__":
    key = jax.random.PRNGKey(0)
    k1, k2, k3, k4 = jax.random.split(key, 4)

    # --- Test 1: shapes/init exactly matching LoRALayer (B = zeros) ----------
    batch, seq, in_dim, out_dim, rank = 2, 8, 32, 32, 4
    alpha = 4.0
    std_dev = 1.0 / jnp.sqrt(jnp.float32(rank))
    A = jax.random.normal(k1, (in_dim, rank), dtype=jnp.float32) * std_dev
    B = jnp.zeros((rank, out_dim), dtype=jnp.float32)
    x = jax.random.normal(k2, (batch, seq, in_dim), dtype=jnp.float32)

    out = jax.block_until_ready(lora_forward(x, A, B, alpha))
    ref = alpha * (x @ A @ B)
    assert out.shape == (batch, seq, out_dim)
    assert jnp.allclose(out, ref, atol=1e-5, rtol=1e-5)

    # --- Test 2: non-zero B with ragged dims ---------------------------------
    # Exercises both matmuls, alpha scaling, a partial last M tile (M = 111)
    # and a non-128-multiple out_dim, all without wrapper-side padding copies.
    batch2, seq2, in_dim2, out_dim2, rank2 = 3, 37, 96, 200, 8
    alpha2 = 2.0
    A2 = jax.random.normal(k3, (in_dim2, rank2), dtype=jnp.float32) / jnp.sqrt(
        jnp.float32(rank2)
    )
    B2 = jax.random.normal(k4, (rank2, out_dim2), dtype=jnp.float32) * 0.1
    x2 = jax.random.normal(k1, (batch2, seq2, in_dim2), dtype=jnp.float32)

    out2 = jax.block_until_ready(lora_forward(x2, A2, B2, alpha2))
    ref2 = alpha2 * (x2 @ A2 @ B2)
    assert out2.shape == (batch2, seq2, out_dim2)
    assert jnp.allclose(out2, ref2, atol=1e-4, rtol=1e-4)

    # --- Test 3: multiple N tiles (exercises the cached x@A reuse over j) ----
    batch3, seq3, in_dim3, out_dim3, rank3 = 2, 8, 64, 2176, 4
    alpha3 = 1.5
    A3 = jax.random.normal(k2, (in_dim3, rank3), dtype=jnp.float32) / jnp.sqrt(
        jnp.float32(rank3)
    )
    B3 = jax.random.normal(k3, (rank3, out_dim3), dtype=jnp.float32) * 0.1
    x3 = jax.random.normal(k4, (batch3, seq3, in_dim3), dtype=jnp.float32)

    out3 = jax.block_until_ready(lora_forward(x3, A3, B3, alpha3))
    ref3 = alpha3 * (x3 @ A3 @ B3)
    assert out3.shape == (batch3, seq3, out_dim3)
    assert jnp.allclose(out3, ref3, atol=1e-4, rtol=1e-4)

    print("KERNEL_OK")
</pallas_src>

<mosaic_0001>
module attributes {stable_mosaic.version = 11 : i64} {
  func.func @_lora_kernel(%arg0: i32, %arg1: i32, %arg2: memref<8x32xf32, #tpu.memory_space<vmem>>, %arg3: memref<32x4xf32, #tpu.memory_space<vmem>>, %arg4: memref<4x32xf32, #tpu.memory_space<vmem>>, %arg5: memref<8x32xf32, #tpu.memory_space<vmem>>, %arg6: memref<8x4xf32, #tpu.memory_space<vmem>>) attributes {dimension_semantics = [#tpu.dimension_semantics<parallel>, #tpu.dimension_semantics<arbitrary>], iteration_bounds = array<i64: 2, 1>, scalar_prefetch = 0 : i64, scratch_operands = 1 : i64, tpu.core_type = #tpu.core_type<tc>, window_params = [{transform_indices = @transform_0, window_bounds = array<i64: 8, 32>}, {pipeline_mode = #tpu.pipeline_mode<synchronous>, transform_indices = @transform_1, window_bounds = array<i64: 32, 4>}, {transform_indices = @transform_2, window_bounds = array<i64: 4, 32>}, {transform_indices = @transform_3, window_bounds = array<i64: 8, 32>}]} {
    %c0_i32 = arith.constant 0 : i32
    %0 = arith.cmpi eq, %arg1, %c0_i32 : i32
    %1 = arith.extui %0 : i1 to i32
    %c0_i32_0 = arith.constant 0 : i32
    %2 = arith.cmpi ne, %1, %c0_i32_0 : i32
    scf.if %2 {
      %c0_6 = arith.constant 0 : index
      %c0_7 = arith.constant 0 : index
      %7 = vector.load %arg2[%c0_6, %c0_7] : memref<8x32xf32, #tpu.memory_space<vmem>>, vector<8x32xf32>
      %c0_8 = arith.constant 0 : index
      %c0_9 = arith.constant 0 : index
      %8 = vector.load %arg3[%c0_8, %c0_9] : memref<32x4xf32, #tpu.memory_space<vmem>>, vector<32x4xf32>
      %cst_10 = arith.constant dense<0.000000e+00> : vector<8x4xf32>
      %9 = tpu.matmul %7, %8, %cst_10 {dimension_numbers = #tpu.dot_dimension_numbers<[1], [0], [0], [1], [0, 0, 1, 1], [], []>} : vector<8x32xf32>, vector<32x4xf32>, vector<8x4xf32> -> vector<8x4xf32>
      %cst_11 = arith.constant 4.000000e+00 : f32
      %10 = vector.broadcast %cst_11 : f32 to vector<8x4xf32>
      %11 = arith.mulf %10, %9 : vector<8x4xf32>
      %c0_12 = arith.constant 0 : index
      %c0_13 = arith.constant 0 : index
      %12 = vector.load %arg6[%c0_12, %c0_13] : memref<8x4xf32, #tpu.memory_space<vmem>>, vector<8x4xf32>
      tpu.vector_store %arg6[%c0_12, %c0_13], %11 {strides = array<i32>} : memref<8x4xf32, #tpu.memory_space<vmem>>, vector<8x4xf32>,
    } else {
    }
    %c0 = arith.constant 0 : index
    %c0_1 = arith.constant 0 : index
    %3 = vector.load %arg6[%c0, %c0_1] : memref<8x4xf32, #tpu.memory_space<vmem>>, vector<8x4xf32>
    %c0_2 = arith.constant 0 : index
    %c0_3 = arith.constant 0 : index
    %4 = vector.load %arg4[%c0_2, %c0_3] : memref<4x32xf32, #tpu.memory_space<vmem>>, vector<4x32xf32>
    %cst = arith.constant dense<0.000000e+00> : vector<8x32xf32>
    %5 = tpu.matmul %3, %4, %cst {dimension_numbers = #tpu.dot_dimension_numbers<[1], [0], [0], [1], [0, 0, 1, 1], [], []>} : vector<8x4xf32>, vector<4x32xf32>, vector<8x32xf32> -> vector<8x32xf32>
    %c0_4 = arith.constant 0 : index
    %c0_5 = arith.constant 0 : index
    %6 = vector.load %arg5[%c0_4, %c0_5] : memref<8x32xf32, #tpu.memory_space<vmem>>, vector<8x32xf32>
    tpu.vector_store %arg5[%c0_4, %c0_5], %5 {strides = array<i32>} : memref<8x32xf32, #tpu.memory_space<vmem>>, vector<8x32xf32>,
    return
  }
  func.func @transform_0(%arg0: i32, %arg1: i32) -> (i32, i32) {
    %c0_i32 = arith.constant 0 : i32
    %c0_i32_0 = arith.constant 0 : i32
    return %arg0, %c0_i32 : i32, i32
  }
  func.func @transform_1(%arg0: i32, %arg1: i32) -> (i32, i32) {
    %c0_i32 = arith.constant 0 : i32
    %c0_i32_0 = arith.constant 0 : i32
    %c0_i32_1 = arith.constant 0 : i32
    return %c0_i32, %c0_i32_0 : i32, i32
  }
  func.func @transform_2(%arg0: i32, %arg1: i32) -> (i32, i32) {
    %c0_i32 = arith.constant 0 : i32
    %c0_i32_0 = arith.constant 0 : i32
    return %c0_i32, %arg1 : i32, i32
  }
  func.func @transform_3(%arg0: i32, %arg1: i32) -> (i32, i32) {
    %c0_i32 = arith.constant 0 : i32
    return %arg0, %arg1 : i32, i32
  }
}

</mosaic_0001>

<bundles_post_ra>
// kernel: tpu_custom_call.1
= control target key start
LH: loop header
LB: loop body
LE: loop exit
PB: predicated region body
PF: predicated region fallthrough
CT: control target
= control target key end

     0   :  { %8 = vsyncpa [#allocation4], 0  ;;  %s798_s0 = inlined_call_operand.vmem [shape: f32[16,32], index: 0, kind: input, shape index: {}]   ;;  %s799_s1 = inlined_call_operand.vmem [shape: f32[32,4], index: 1, kind: input, shape index: {}]   ;;  %s800_s2 = inlined_call_operand.vmem [shape: f32[4,32], index: 2, kind: input, shape index: {}]   ;;  %s801_s3 = inlined_call_operand.hbm [shape: f32[16,32], index: 3, kind: output, shape index: {}]  }
   0x1   :  { %10 = vsyncpa [#allocation4 + $0x1], 0  ;;  %s669_s12 = smov 0   ;;  %s671_s13 = smov 0  }
   0x2   :  { %s673_s14 = smov 0   ;;  %s675_s15 = smov 0  }
   0x3   :  { %s677_s16 = smov 0   ;;  %s679_s17 = smov 0  }
   0x4 LB: > { %s463_s18 = sadd.s32 4294967295, %s643_s17   ;;  %s464_s19 = sadd.s32 4294967294, %s643_s17   ;;  %s643_s17 = sphi %s679_s17, %s16_s17   ;;  %s639_s16 = sphi %s677_s16, %s808_s16   ;;  %s635_s15 = sphi %s675_s15, %s807_s15   ;;  %s631_s14 = sphi %s673_s14, %s806_s14   ;;  %s627_s13 = sphi %s671_s13, %s805_s13   ;;  %s623_s12 = sphi %s669_s12, %s804_s12  }
   0x5   : > { %s28_s20 = sadd.s32 1, %s639_s16  ;;  %s110_s21 = sadd.s32 1, %s631_s14 }
   0x6   : > { %p30_p0 = scmp.ge.s32.totalorder %s28_s20, 2  ;;  %p120_p1 = scmp.ne.s32.totalorder %s631_s14, %s627_s13 }
   0x7   : > { %p121_p2 = scmp.eq.s32.totalorder %s463_s18, 1  ;;  %p126_p3 = scmp.ne.s32.totalorder %s627_s13, %s623_s12 }
   0x8   : > { %s810_s20 = smov (%p30_p0, %s28_s20), 0  ;;  %p127_p5 = scmp.eq.s32.totalorder %s464_s19, 1 }
   0x9   : > { %p709_p4 = por %p121_p2, %p120_p1  ;;  %s105_s23 = ssub.s32 %s639_s16, %s810_s20 }
   0xa   : > { %p468_p6 = scmp.ge.s32.totalorder %s643_s17, 1  ;;  %p108_p7 = scmp.eq.s32.totalorder %s105_s23, 0 }
   0xb   : > { %p716_p8 = por %p127_p5, %p126_p3  ;;  %p162_p9 = scmp.lt.s32.totalorder %s643_s17, 3 }
   0xc   : > { %s722_s25 = scalar_select %p108_p7, %s631_s14, %s110_s21  }
   0xd   : > { %p163_p10 = pnand %p468_p6, %p162_p9 }
   0xe   : > { %v202_v0 = vld [vmem:[%s799_s1] sm:$0xff] (!%p163_p10)  ;;  %v203_v1 = vld [vmem:[%s799_s1 + $0x8] sm:$0xff] (!%p163_p10)  ;;  %v204_v2 = vld [vmem:[%s799_s1 + $0x10] sm:$0xff] (!%p163_p10)  ;;  %v645_v3 = vmov (!%p163_p10), 0.0|0.0   ;;  %vm646_vm0 = vmmov (!%p163_p10), 0   ;;  %v647_v6 = vmov (!%p163_p10), 0.0  }
   0xf   : > { %166 = sbr.rel (%p163_p10) target bundleno = 475 (0x1db), region = 32  ;;  %501 = vmatprep.subr.bf16.mxu0 (!%p163_p10), %v645_v3  ;;  %v502_v4 = vpack.c.bf16 (!%p163_p10), %v203_v1, %v202_v0  ;;  %v205_v5 = vld [vmem:[%s799_s1 + $0x18] sm:$0xff] (!%p163_p10)  ;;  %493 = vmatprep.mubr.msk.f32.mxu0 (!%p163_p10), %vm646_vm0, %v647_v6  ;;  %p189_p11 = scmp.lt.s32.totalorder (!%p163_p10), %s635_s15, 1  ;;  %vm206_vm1 = vcmask (!%p163_p10), 261120   ;;  %v284_v9 = vld [vmem:[%s800_s2] sm:$0xf] (!%p163_p10) }
  0x10   : > { %496 = vmatprep.subr.mxu1 (!%p163_p10), %v647_v6  ;;  %498 = vmatprep.mubr.msk.f32.mxu1 (!%p163_p10), %vm646_vm0, %v647_v6  ;;  %v505_v7 = vpack.c.bf16 (!%p163_p10), %v205_v5, %v204_v2  ;;  %vm289_vm2 = vcmask (!%p163_p10), 1043456   ;;  %vm281_vm3 = vcmask (!%p163_p10), 31744   ;;  %s186_s21 = sand.u32 (!%p163_p10), 1, %s627_s13   ;;  %s475_s26 = sshll.u32 (!%p163_p10), %s635_s15, 7 }
  0x11   : > { %503 = vmatpush3.bf16.msra.mxu0 (!%p163_p10), %v502_v4  ;;  %497 = vmatpush3.msk.msra.mxu1 (!%p163_p10), %vm289_vm2, %v284_v9  ;;  %s469_s23 = sshll.u32 (!%p163_p10), %s186_s21, 3  ;;  %s750_s4 = scalar_lea.hbm (!%p163_p10), %s801_s3, %s475_s26 }
  0x12   : > { %504 = vmatprep.subr.bf16.mxu0 (!%p163_p10), %v645_v3  ;;  %s188_s27 = scalar_lea.vmem (!%p163_p10), [#allocation3], %s469_s23  ;;  %s366_s5 = scalar_lea.sflag (!%p163_p10), [#allocation4], %s186_s21 }
  0x13   : > { %s380_s28 = sshll.u32 (!%p163_p10), %s188_s27, 4  ;;  %s752_s28 = int_to_ptr.vmem [resolvable:$true] %s380_s28 }
  0x14   : > { %s565_s6 = scalar_lea.vmem (!%p163_p10), %s752_s28, 128 }
  0x15   : > { %506 = vmatpush3.bf16.msra.mxu0 (!%p163_p10), %v505_v7  ;;  %p566_p12 = scmp.ne.s32.totalorder (!%p163_p10), %s752_s28, %s565_s6 }
  0x16   : > { %s190_s7 = scalar_select %p189_p11, %s635_s15, 1 }
  0x17   : > { %p567_p13 = pnand %p566_p12, %p709_p4  ;;  %s648_s15 = smov [#allocation3]  }
  0x18   : > { %s470_s8 = sshll.u32 %s190_s7, 3  ;;  %s569_s7 = sshll.u32 %s648_s15, 4  ;;  %s570_s7 = int_to_ptr.vmem [resolvable:$false] %s569_s7 }
  0x19   : > { %s192_s11 = scalar_lea.vmem %s798_s0, %s470_s8  ;;  %p568_p0 = pneg %p567_p13 }
  0x1a   : > { %v201_v8 = vld [vmem:[%s192_s11] sm:$0xff]  ;;  %s571_s8 = scalar_lea.vmem %s570_s7, 256  ;;  %p572_p1 = scmp.lt.s32.totalorder %s752_s28, %s570_s7 }
  0x1b   : > { %494 = vmatmul.mubr.msk.f32.vlgmr.msra.gmra.mrb[0].mxu0 %vm206_vm1, %v201_v8  ;;  %p573_p2 = scmp.lt.s32.totalorder %s571_s8, %s565_s6 }
  0x1d   : > { %p574_p3 = por %p573_p2, %p572_p1 }
  0x1f   : > { %p575_p5 = pnand %p574_p3, %p568_p0 }
  0xee   : > { %v276_v10 = vpop.f32.mrb[0].mxu0 }
  0xef   : > { %v280_v11 = vmul.f32 4.0, %v276_v10  ;;  %v495_v12 = vpop.f32.mrb[1].mxu0 }
  0xf1   : > { %282 = vst.msk [vmem:[#allocation2] sm:$0xff] %vm281_vm3, %v280_v11 }
  0xf8   : > { %v283_v13 = vld [vmem:[#allocation2] sm:$0xff] }
  0xf9   : > { %499 = vmatmul.mubr.msk.f32.vlgmr.msra.gmra.mrb[0].mxu1 %vm281_vm3, %v283_v13 }
 0x1cc   : > { %v359_v14 = vpop.f32.mrb[0].mxu1 }
 0x1cd   : > { %364 = vst.msk [vmem:[%s188_s27] sm:$0xff] %vm206_vm1, %v359_v14  ;;  %v500_v15 = vpop.f32.mrb[1].mxu1 }
 0x1ce   : > { %578 = shalt.err (!%p575_p5)
}
 0x1cf   : > { %s579_s9 = scalar_lea.hbm %s750_s4, 128  ;;  %s583_s18 = scalar_lea.hbm %s801_s3, 256 }
 0x1d0   : > { %p580_p6 = scmp.ne.s32.totalorder %s750_s4, %s579_s9  ;;  %p584_p10 = scmp.lt.u32.totalorder %s750_s4, %s801_s3 }
 0x1d1   : > { %p585_p11 = scmp.lt.u32.totalorder %s583_s18, %s579_s9  ;;  %p587_p13 = scmp.lt.u32.totalorder %s579_s9, %s750_s4 }
 0x1d2   : > { %p581_p7 = pnand %p580_p6, %p709_p4 }
 0x1d3   : > { %p586_p12 = por %p585_p11, %p584_p10 }
 0x1d4   : > { %p582_p9 = pneg %p581_p7 }
 0x1d5   : > { %p588_p0 = por %p587_p13, %p586_p12 }
 0x1d7   : > { %p589_p1 = pnand %p588_p0, %p582_p9 }
 0x1d9   : > { %592 = shalt.err (!%p589_p1)
}
 0x1da   : > { %507 = dma.vmem_to_hbm [thread:$0]  (%p709_p4), %s752_s28, 128, %s750_s4, %s366_s5  }
 0x1db PF: > { %p513_p2 = scmp.ge.s32.totalorder %s643_s17, 2  ;;  %s392_s23 = sand.u32 1, %s623_s12  }
 0x1dc   : > { %s393_s26 = scalar_lea.sflag [#allocation4], %s392_s23 }
 0x1dd   : > { %p510_p3 = pnand %p513_p2, %p716_p8 }
 0x1df   : > { %618 = dma.done.wait (!%p510_p3), %s393_s26, 128  }
 0x1e0   : > { %620 = vsyncadd (!%p510_p3), %s393_s26, 4294967168  ;;  %s16_s17 = sadd.s32 1, %s643_s17   ;;  %s804_s12 = smov %s627_s13 }
 0x1e1   : > { %p13_p5 = scmp.ge.s32.totalorder %s16_s17, 4   ;;  %s805_s13 = smov %s631_s14 }
 0x1e2   : > { %s806_s14 = smov %s722_s25  ;;  %s807_s15 = smov %s639_s16 }
 0x1e3   : > { %s808_s16 = smov %s810_s20  ;;  %15 = sbr.rel (!%p13_p5) target bundleno = 4 (0x4), region = 74 }
 0x1ea   :  { %398 = vsyncpa [#allocation4], 1 }
 0x1eb   :  { %400 = vsyncpa [#allocation4 + $0x1], 1 }

</bundles_post_ra>
